<compile_context>
chip_gen: v7x
topology: tpu7x:2x2x1
jax: 0.10.0
libtpu: 0.0.40
codegen_flags: <defaults>
</compile_context>

<pallas_src>
import functools

import jax
import jax.numpy as jnp
from jax.experimental import pallas as pl
from jax.experimental.pallas import tpu as pltpu

LANE = 128            # lane width: keep the last dim a full multiple of 128
SUBLANE = 8           # (8, 128) tiling constraint
TILE_ROWS_MAX = 512   # 512x128 f32 = 256 KiB per buffer; 3 arrays double-buffered
                      # ~1.5 MiB -> far under scoped VMEM on v5e/v6e and v7x (64 MiB phys)


def _gumbel_sigmoid_kernel(logits_ref, u_ref, out_ref, *, inv_tau):
    """m_soft = sigmoid((logits + gumbel(u)) * inv_tau).  All math stays f32
    (v5e VPU/EUP have no bf16 path)."""
    u = u_ref[...]
    gumbel = -jnp.log(-jnp.log(u + jnp.float32(1e-10)))
    out_ref[...] = jax.nn.sigmoid((logits_ref[...] + gumbel) * jnp.float32(inv_tau))


def _pad_flat(flat, pad, fill):
    if pad:
        flat = jnp.pad(flat, (0, pad), constant_values=fill)
    return flat


def gumbel_soft_mask(logits, key, tau):
    seq_len, feat_dim = logits.shape
    n = seq_len * feat_dim

    # Uniform noise ~ U[0,1), matching torch.rand_like(self.logits).
    u = jax.random.uniform(key, (n,), dtype=jnp.float32)

    # Lane-dense layout: flatten to (rows, 128), pad rows to a multiple of the
    # tile size (and of 8 for the sublane constraint).
    rows = pl.cdiv(n, LANE)
    rows = pl.cdiv(rows, SUBLANE) * SUBLANE
    tile_rows = min(TILE_ROWS_MAX, rows)
    padded_rows = pl.cdiv(rows, tile_rows) * tile_rows
    padded_n = padded_rows * LANE
    pad = padded_n - n

    x2d = _pad_flat(logits.reshape(-1).astype(jnp.float32), pad, 0.0
                    ).reshape(padded_rows, LANE)
    u2d = _pad_flat(u, pad, 0.5).reshape(padded_rows, LANE)

    out2d = pl.pallas_call(
        functools.partial(_gumbel_sigmoid_kernel, inv_tau=1.0 / float(tau)),
        out_shape=jax.ShapeDtypeStruct((padded_rows, LANE), jnp.float32),
        grid=(padded_rows // tile_rows,),
        in_specs=[pl.BlockSpec((tile_rows, LANE), lambda i: (i, 0)),
                  pl.BlockSpec((tile_rows, LANE), lambda i: (i, 0))],
        out_specs=pl.BlockSpec((tile_rows, LANE), lambda i: (i, 0)),
        compiler_params=pltpu.CompilerParams(
            dimension_semantics=("parallel",)),   # megacore sharding on v7x
    )(x2d, u2d)

    return out2d.reshape(-1)[:n].reshape(seq_len, feat_dim)


def mask_generator_forward(logits, seed, tau=0.1, max_missing=0.2, training=True):
    """Mirrors MaskGenerator.forward(): gumbel noise is applied in both train and
    eval mode (as in the PyTorch module); eval mode binarizes at the max_missing
    quantile of m_soft."""
    key = jax.random.PRNGKey(seed)
    m_soft = gumbel_soft_mask(logits, key, tau)
    if training:
        return m_soft
    # TODO(synk): torch.quantile needs a full sort; done in plain JAX (linear
    # interpolation, matching torch's default).  The one-op compare is left to
    # XLA so it fuses with the quantile epilogue instead of a second pallas_call.
    threshold = jnp.quantile(m_soft.reshape(-1), max_missing)
    return (m_soft > threshold).astype(jnp.float32)


if __name__ == "__main__":
    # Module __init__ shapes: logits is (seq_len, feat_dim).
    seq_len, feat_dim = 8, 32
    tau, max_missing = 0.1, 0.2

    key = jax.random.PRNGKey(0)
    logits = jax.random.normal(key, (seq_len, feat_dim), dtype=jnp.float32)

    # training mode: soft gumbel-sigmoid mask
    m_soft = mask_generator_forward(logits, seed=0, tau=tau,
                                    max_missing=max_missing, training=True)
    # eval mode: hard binarized mask at the max_missing quantile
    m_hard = mask_generator_forward(logits, seed=0, tau=tau,
                                    max_missing=max_missing, training=False)

    jax.block_until_ready((m_soft, m_hard))

    assert m_soft.shape == (seq_len, feat_dim) and m_soft.dtype == jnp.float32
    assert m_hard.shape == (seq_len, feat_dim) and m_hard.dtype == jnp.float32
    assert bool(jnp.all((m_soft >= 0.0) & (m_soft <= 1.0)))
    assert bool(jnp.all((m_hard == 0.0) | (m_hard == 1.0)))

    print("KERNEL_OK")
</pallas_src>

<mosaic_0001>
module attributes {stable_mosaic.version = 11 : i64} {
  func.func @_gumbel_sigmoid_kernel(%arg0: i32, %arg1: memref<8x128xf32, #tpu.memory_space<vmem>>, %arg2: memref<8x128xf32, #tpu.memory_space<vmem>>, %arg3: memref<8x128xf32, #tpu.memory_space<vmem>>) attributes {dimension_semantics = [#tpu.dimension_semantics<parallel>], iteration_bounds = array<i64: 1>, scalar_prefetch = 0 : i64, scratch_operands = 0 : i64, tpu.core_type = #tpu.core_type<tc>, window_params = [{transform_indices = @transform_0, window_bounds = array<i64: 8, 128>}, {transform_indices = @transform_1, window_bounds = array<i64: 8, 128>}, {transform_indices = @transform_2, window_bounds = array<i64: 8, 128>}]} {
    %c0 = arith.constant 0 : index
    %c0_0 = arith.constant 0 : index
    %0 = vector.load %arg2[%c0, %c0_0] : memref<8x128xf32, #tpu.memory_space<vmem>>, vector<8x128xf32>
    %cst = arith.constant 1.000000e-10 : f32
    %1 = vector.broadcast %cst : f32 to vector<8x128xf32>
    %2 = arith.addf %0, %1 : vector<8x128xf32>
    %3 = math.log %2 : vector<8x128xf32>
    %cst_1 = arith.constant 0.000000e+00 : f32
    %4 = vector.broadcast %cst_1 : f32 to vector<8x128xf32>
    %5 = arith.subf %4, %3 : vector<8x128xf32>
    %6 = math.log %5 : vector<8x128xf32>
    %cst_2 = arith.constant 0.000000e+00 : f32
    %7 = vector.broadcast %cst_2 : f32 to vector<8x128xf32>
    %8 = arith.subf %7, %6 : vector<8x128xf32>
    %c0_3 = arith.constant 0 : index
    %c0_4 = arith.constant 0 : index
    %9 = vector.load %arg1[%c0_3, %c0_4] : memref<8x128xf32, #tpu.memory_space<vmem>>, vector<8x128xf32>
    %10 = arith.addf %9, %8 : vector<8x128xf32>
    %cst_5 = arith.constant 1.000000e+01 : f32
    %11 = vector.broadcast %cst_5 : f32 to vector<8x128xf32>
    %12 = arith.mulf %10, %11 : vector<8x128xf32>
    %13 = arith.negf %12 : vector<8x128xf32>
    %14 = math.exp %13 : vector<8x128xf32>
    %cst_6 = arith.constant 1.000000e+00 : f32
    %15 = vector.broadcast %cst_6 : f32 to vector<8x128xf32>
    %16 = arith.addf %15, %14 : vector<8x128xf32>
    %17 = arith.divf %15, %16 : vector<8x128xf32>
    %c0_7 = arith.constant 0 : index
    %c0_8 = arith.constant 0 : index
    %18 = vector.load %arg3[%c0_7, %c0_8] : memref<8x128xf32, #tpu.memory_space<vmem>>, vector<8x128xf32>
    tpu.vector_store %arg3[%c0_7, %c0_8], %17 {strides = array<i32>} : memref<8x128xf32, #tpu.memory_space<vmem>>, vector<8x128xf32>,
    return
  }
  func.func @transform_0(%arg0: i32) -> (i32, i32) {
    %c0_i32 = arith.constant 0 : i32
    %c0_i32_0 = arith.constant 0 : i32
    return %arg0, %c0_i32 : i32, i32
  }
  func.func @transform_1(%arg0: i32) -> (i32, i32) {
    %c0_i32 = arith.constant 0 : i32
    %c0_i32_0 = arith.constant 0 : i32
    return %arg0, %c0_i32 : i32, i32
  }
  func.func @transform_2(%arg0: i32) -> (i32, i32) {
    %c0_i32 = arith.constant 0 : i32
    %c0_i32_0 = arith.constant 0 : i32
    return %arg0, %c0_i32 : i32, i32
  }
}

</mosaic_0001>

<bundles_post_ra>
// kernel: tpu_custom_call.1
= control target key start
LH: loop header
LB: loop body
LE: loop exit
PB: predicated region body
PF: predicated region fallthrough
CT: control target
= control target key end

     0   :  { %7 = vsyncpa [#allocation3], 0  ;;  %s208_s0 = inlined_call_operand.hbm [shape: f32[8,128], index: 0, kind: input, shape index: {}]   ;;  %s209_s1 = inlined_call_operand.hbm [shape: f32[8,128], index: 1, kind: input, shape index: {}]   ;;  %s210_s2 = inlined_call_operand.hbm [shape: f32[8,128], index: 2, kind: output, shape index: {}]  }
   0x1   :  { %8 = vsyncpa [#allocation6], 0 }
   0x2   :  { %9 = vsyncpa [#allocation4], 0  ;;  %s154_s9 = smov [#allocation2]   ;;  %s155_s11 = smov [#allocation5]  }
   0x3   :  { %s16_s10 = sshll.u32 %s154_s9, 4  ;;  %s26_s12 = sshll.u32 %s155_s11, 4  ;;  %s17_s10 = int_to_ptr.vmem [resolvable:$true] %s16_s10  ;;  %s27_s12 = int_to_ptr.vmem [resolvable:$true] %s26_s12 }
   0x4   :  { %s82_s15 = scalar_lea.hbm %s208_s0, 128 }
   0x5   :  { %p83_p0 = scmp.ne.s32.totalorder %s208_s0, %s82_s15  ;;  %p86_p1 = scmp.lt.u32.totalorder %s82_s15, %s208_s0 }
   0x7   :  { %p88_p2 = pnand %p86_p1, %p83_p0 }
   0x9   :  { %91 = shalt.err (!%p88_p2)
}
   0xa   :  { %s92_s20 = scalar_lea.vmem %s17_s10, 128  ;;  %p97_p4 = scmp.lt.s32.totalorder %s17_s10, %s17_s10 }
   0xb   :  { %p93_p3 = scmp.ne.s32.totalorder %s17_s10, %s92_s20  ;;  %p98_p5 = scmp.lt.s32.totalorder %s92_s20, %s92_s20 }
   0xd   :  { %p99_p6 = por %p98_p5, %p97_p4 }
   0xf   :  { %p100_p7 = pnand %p99_p6, %p93_p3 }
  0x11   :  { %103 = shalt.err (!%p100_p7)
}
  0x12   :  { %19 = dma.hbm_to_vmem [thread:$0]  %s208_s0, 128, %s17_s10, [#allocation3]  }
  0x13   :  { %s104_s25 = scalar_lea.hbm %s209_s1, 128 }
  0x14   :  { %p105_p8 = scmp.ne.s32.totalorder %s209_s1, %s104_s25  ;;  %p108_p9 = scmp.lt.u32.totalorder %s104_s25, %s209_s1 }
  0x16   :  { %p110_p10 = pnand %p108_p9, %p105_p8 }
  0x18   :  { %113 = shalt.err (!%p110_p10)
}
  0x19   :  { %s114_s30 = scalar_lea.vmem %s27_s12, 128  ;;  %p119_p12 = scmp.lt.s32.totalorder %s27_s12, %s27_s12 }
  0x1a   :  { %p115_p11 = scmp.ne.s32.totalorder %s27_s12, %s114_s30  ;;  %p120_p13 = scmp.lt.s32.totalorder %s114_s30, %s114_s30 }
  0x1c   :  { %p121_p0 = por %p120_p13, %p119_p12 }
  0x1e   :  { %p122_p1 = pnand %p121_p0, %p115_p11 }
  0x20   :  { %125 = shalt.err (!%p122_p1)
}
  0x21   :  { %29 = dma.hbm_to_vmem [thread:$0]  %s209_s1, 128, %s27_s12, [#allocation6]  }
  0x22   :  { %148 = dma.done.wait [#allocation3], 128  }
  0x23   :  { %149 = vsyncadd [#allocation3], 4294967168 }
  0x24   :  { %150 = dma.done.wait [#allocation6], 128  }
  0x25   :  { %151 = vsyncadd [#allocation6], 4294967168  ;;  %v36_v0 = vld [vmem:[#allocation5] sm:$0xff]  ;;  %v44_v7 = vld [vmem:[#allocation2] sm:$0xff]  ;;  %s156_s1 = smov [#allocation7]  }
  0x26   :  { %v37_v1 = vadd.f32 1e-10, %v36_v0  ;;  %s60_s4 = sshll.u32 %s156_s1, 4  ;;  %s61_s4 = int_to_ptr.vmem [resolvable:$true] %s60_s4 }
  0x27   :  { %s126_s5 = scalar_lea.vmem %s61_s4, 128  ;;  %p131_p3 = scmp.lt.s32.totalorder %s61_s4, %s61_s4 }
  0x28   :  { %74 = vlog2.f32 %v37_v1  ;;  %p127_p2 = scmp.ne.s32.totalorder %s61_s4, %s126_s5  ;;  %p132_p4 = scmp.lt.s32.totalorder %s126_s5, %s126_s5 }
  0x2a   :  { %p133_p5 = por %p132_p4, %p131_p3 }
  0x2c   :  { %p134_p6 = pnand %p133_p5, %p127_p2 }
  0x32   :  { %v75_v2 = vpop.eup %74 }
  0x33   :  { %v39_v3 = vmul.f32 0.6931472, %v75_v2 }
  0x35   :  { %v40_v4 = vsub.f32 0.0, %v39_v3 }
  0x37   :  { %76 = vlog2.f32 %v40_v4 }
  0x41   :  { %v77_v5 = vpop.eup %76 }
  0x42   :  { %v42_v6 = vmul.f32 0.6931472, %v77_v5 }
  0x44   :  { %v43_v8 = vsub.f32 0.0, %v42_v6 }
  0x46   :  { %v45_v9 = vadd.f32 %v44_v7, %v43_v8 }
  0x48   :  { %v70_v10 = vmul.f32 -10.0, %v45_v9 }
  0x4a   :  { %v48_v11 = vmul.f32 1.442695, %v70_v10 }
  0x4c   :  { %78 = vpow2.f32 %v48_v11 }
  0x56   :  { %v79_v12 = vpop.eup %78 }
  0x57   :  { %v50_v13 = vadd.f32 1.0, %v79_v12 }
  0x59   :  { %80 = vrcp.f32 %v50_v13 }
  0x63   :  { %v81_v14 = vpop.eup %80 }
  0x64   :  { %53 = vst [vmem:[#allocation7] sm:$0xff] %v81_v14 }
  0x65   :  { %137 = shalt.err (!%p134_p6)
}
  0x66   :  { %s138_s8 = scalar_lea.hbm %s210_s2, 128 }
  0x67   :  { %p139_p7 = scmp.ne.s32.totalorder %s210_s2, %s138_s8  ;;  %p142_p8 = scmp.lt.u32.totalorder %s138_s8, %s210_s2 }
  0x69   :  { %p144_p9 = pnand %p142_p8, %p139_p7 }
  0x6b   :  { %147 = shalt.err (!%p144_p9)
}
  0x6c   :  { %63 = dma.vmem_to_hbm [thread:$0]  %s61_s4, 128, %s210_s2, [#allocation4]  }
  0x6d   :  { %152 = dma.done.wait [#allocation4], 128  }
  0x6e   :  { %153 = vsyncadd [#allocation4], 4294967168 }
  0x6f   :  { %67 = vsyncpa [#allocation3], 1 }
  0x70   :  { %68 = vsyncpa [#allocation6], 1 }
  0x71   :  { %69 = vsyncpa [#allocation4], 1 }

</bundles_post_ra>
